<compile_context>
chip_gen: v5e
topology: v5e:2x2
jax: 0.10.0
libtpu: 0.0.40
codegen_flags: <defaults>
</compile_context>

<pallas_src>
import jax
import jax.numpy as jnp
from jax import lax
from jax.experimental import pallas as pl
from jax.experimental.pallas import tpu as pltpu


def _round_up(x, m):
    return ((x + m - 1) // m) * m


def _item_db_onehot_kernel(idx_ref, table_ref, out_ref):
    # idx_ref   : VMEM (TB, 1) int32  -- publisher ids (x[:, 0])
    # table_ref : VMEM (N, Dp)        -- full embedding table, resident (1 buffer)
    # out_ref   : VMEM (TB, Dp)       -- gathered embedding rows
    tb = out_ref.shape[0]
    n = table_ref.shape[0]
    idx = idx_ref[...]  # (TB, 1)
    # Exact one-hot gather on the MXU: (TB, N) @ (N, Dp) with 0/1 weights.
    one_hot = (idx == lax.broadcasted_iota(jnp.int32, (tb, n), 1)).astype(
        table_ref.dtype
    )
    out_ref[...] = jnp.dot(
        one_hot, table_ref[...], preferred_element_type=jnp.float32
    ).astype(out_ref.dtype)


def _item_db_take_kernel(idx_ref, table_ref, out_ref):
    # Large-vocabulary variant: true gather on the VMEM-resident table,
    # O(TB*Dp) regardless of N (no (TB, N) one-hot intermediate).
    idx = idx_ref[:, 0]  # (TB,)
    out_ref[...] = jnp.take(table_ref[...], idx, axis=0).astype(out_ref.dtype)


def item_db_forward(x, embedding_publisher, *, block_rows=512, onehot_max_n=1024):
    """Pallas equivalent of itemDB.forward: returns embedding_publisher[x[:, 0]]."""
    B, F = x.shape
    N, D = embedding_publisher.shape
    del F  # only column 0 of x is ever used

    # ---- lane-dense output: pad embedding width to a multiple of 128 ------
    d_pad = _round_up(D, 128)
    table = embedding_publisher
    if d_pad != D:
        table = jnp.pad(table, ((0, 0), (0, d_pad - D)))
    itemsize = table.dtype.itemsize
    table_bytes = N * d_pad * itemsize  # single-buffered (see BlockSpec below)

    # ---- only x[:, 0] is needed: slice in the wrapper ----------------------
    idx = x[:, :1].astype(jnp.int32)  # (B, 1)

    # ---- batch tile sizing --------------------------------------------------
    tb = min(block_rows, _round_up(B, 8))
    tb = _round_up(tb, 8)
    # Keep >= 2 grid steps when the batch allows, so v7x's two TensorCores
    # both get work (no-op on single-TC v5e/v6e).
    if B >= 16:
        tb = min(tb, _round_up(-(-B // 2), 8))

    def _vmem_need(tb_):
        idx_buf = 2 * tb_ * 128 * 4                       # (tb,1) int32, lane-padded, 2 bufs
        out_buf = 2 * tb_ * d_pad * itemsize              # double-buffered output tiles
        onehot = 2 * tb_ * _round_up(N, 128) * 4 if N <= onehot_max_n else 0
        return table_bytes + idx_buf + out_buf + onehot

    VMEM_BUDGET = 40 << 20  # conservative: fits v7x's 64 MiB physical with headroom
    while tb > 8 and _vmem_need(tb) > VMEM_BUDGET:
        tb = _round_up(tb // 2, 8)

    # ---- tail padding on the cheap (B, 1) index column only ----------------
    b_pad = _round_up(B, tb)
    if b_pad != B:
        idx = jnp.pad(idx, ((0, b_pad - B), (0, 0)))  # padded rows gather index 0

    grid = (b_pad // tb,)

    kernel = _item_db_onehot_kernel if N <= onehot_max_n else _item_db_take_kernel
    vmem_limit = int(min(_vmem_need(tb) + (4 << 20), 64 << 20))

    out = pl.pallas_call(
        kernel,
        out_shape=jax.ShapeDtypeStruct((b_pad, d_pad), table.dtype),
        grid_spec=pltpu.PrefetchScalarGridSpec(
            num_scalar_prefetch=0,
            grid=grid,
            in_specs=[
                # Batch tile of publisher indices.
                pl.BlockSpec((tb, 1), lambda i: (i, 0)),
                # Full embedding table, VMEM-resident. Constant index_map ->
                # fetched once; single-buffered so it costs 1x (not 2x) VMEM.
                pl.BlockSpec(
                    (N, d_pad),
                    lambda i: (0, 0),
                    pipeline_mode=pl.Buffered(buffer_count=1),
                ),
            ],
            out_specs=pl.BlockSpec((tb, d_pad), lambda i: (i, 0)),
        ),
        compiler_params=pltpu.CompilerParams(
            # Batch tiles are independent -> shard across TCs on v7x.
            dimension_semantics=("parallel",),
            vmem_limit_bytes=vmem_limit,
        ),
    )(idx, table)

    out = out[:B]
    if d_pad != D:
        out = out[:, :D]
    return out


if __name__ == "__main__":
    # Config (small, consistent with the module's __init__).
    num_publisher = 16
    embedding_dim = 128   # lane-dense embedding width
    batch = 8
    num_features = 3      # x has several item feature columns; column 0 = publisher id

    key = jax.random.PRNGKey(0)
    k_emb, k_idx = jax.random.split(key)

    # Deterministic parameter init (torch.nn.Embedding default is N(0, 1)).
    embedding_publisher = jax.random.normal(
        k_emb, (num_publisher, embedding_dim), dtype=jnp.float32
    )

    # Integer input x of shape (B, F); column 0 holds publisher indices.
    x = jax.random.randint(
        k_idx, (batch, num_features), minval=0, maxval=num_publisher, dtype=jnp.int32
    )

    out = item_db_forward(x, embedding_publisher)
    out = jax.block_until_ready(out)

    # Reference check in plain JAX.
    ref = jnp.take(embedding_publisher, x[:, 0], axis=0)
    assert out.shape == (batch, embedding_dim)
    assert jnp.allclose(out, ref), "Pallas embedding gather mismatch"

    print("KERNEL_OK")
</pallas_src>

<mosaic_0001>
module attributes {stable_mosaic.version = 11 : i64} {
  func.func @_item_db_onehot_kernel(%arg0: i32, %arg1: memref<8x1xi32, #tpu.memory_space<vmem>>, %arg2: memref<16x128xf32, #tpu.memory_space<vmem>>, %arg3: memref<8x128xf32, #tpu.memory_space<vmem>>) attributes {dimension_semantics = [#tpu.dimension_semantics<parallel>], iteration_bounds = array<i64: 1>, scalar_prefetch = 0 : i64, scratch_operands = 0 : i64, tpu.core_type = #tpu.core_type<tc>, window_params = [{transform_indices = @transform_0, window_bounds = array<i64: 8, 1>}, {pipeline_mode = #tpu.pipeline_mode<synchronous>, transform_indices = @transform_1, window_bounds = array<i64: 16, 128>}, {transform_indices = @transform_2, window_bounds = array<i64: 8, 128>}]} {
    %c0 = arith.constant 0 : index
    %c0_0 = arith.constant 0 : index
    %0 = vector.load %arg1[%c0, %c0_0] : memref<8x1xi32, #tpu.memory_space<vmem>>, vector<8x1xi32>
    %1 = tpu.iota {dimensions = array<i32: 1>} : vector<8x16xi32>
    %2 = vector.broadcast %0 : vector<8x1xi32> to vector<8x16xi32>
    %3 = arith.cmpi eq, %2, %1 : vector<8x16xi32>
    %4 = arith.extui %3 : vector<8x16xi1> to vector<8x16xi32>
    %5 = arith.sitofp %4 : vector<8x16xi32> to vector<8x16xf32>
    %c0_1 = arith.constant 0 : index
    %c0_2 = arith.constant 0 : index
    %6 = vector.load %arg2[%c0_1, %c0_2] : memref<16x128xf32, #tpu.memory_space<vmem>>, vector<16x128xf32>
    %cst = arith.constant dense<0.000000e+00> : vector<8x128xf32>
    %7 = tpu.matmul %5, %6, %cst {dimension_numbers = #tpu.dot_dimension_numbers<[1], [0], [0], [1], [0, 0, 1, 1], [], []>} : vector<8x16xf32>, vector<16x128xf32>, vector<8x128xf32> -> vector<8x128xf32>
    %c0_3 = arith.constant 0 : index
    %c0_4 = arith.constant 0 : index
    %8 = vector.load %arg3[%c0_3, %c0_4] : memref<8x128xf32, #tpu.memory_space<vmem>>, vector<8x128xf32>
    tpu.vector_store %arg3[%c0_3, %c0_4], %7 {strides = array<i32>} : memref<8x128xf32, #tpu.memory_space<vmem>>, vector<8x128xf32>,
    return
  }
  func.func @transform_0(%arg0: i32) -> (i32, i32) {
    %c0_i32 = arith.constant 0 : i32
    %c0_i32_0 = arith.constant 0 : i32
    return %arg0, %c0_i32 : i32, i32
  }
  func.func @transform_1(%arg0: i32) -> (i32, i32) {
    %c0_i32 = arith.constant 0 : i32
    %c0_i32_0 = arith.constant 0 : i32
    %c0_i32_1 = arith.constant 0 : i32
    return %c0_i32, %c0_i32_0 : i32, i32
  }
  func.func @transform_2(%arg0: i32) -> (i32, i32) {
    %c0_i32 = arith.constant 0 : i32
    %c0_i32_0 = arith.constant 0 : i32
    return %arg0, %c0_i32 : i32, i32
  }
}

</mosaic_0001>

<bundles_post_ra>
// kernel: tpu_custom_call.1
= control target key start
LH: loop header
LB: loop body
LE: loop exit
PB: predicated region body
PF: predicated region fallthrough
CT: control target
= control target key end

     0   :  { %7 = vsyncpa [#allocation3], 0  ;;  %s172_s0 = inlined_call_operand.vmem [shape: s32[8,1], index: 0, kind: input, shape index: {}]   ;;  %s173_s1 = inlined_call_operand.hbm [shape: f32[16,128], index: 1, kind: input, shape index: {}]   ;;  %s174_s2 = inlined_call_operand.hbm [shape: f32[8,128], index: 2, kind: output, shape index: {}]  }
   0x1   :  { %8 = vsyncpa [#allocation4], 0  ;;  %s15_s11 = sshll.u32 %s173_s1, 4  ;;  %s142_s12 = smov [#allocation2]   ;;  %s16_s11 = int_to_ptr.hbm [resolvable:$true] %s15_s11 }
   0x2   :  { %s17_s13 = sshll.u32 %s142_s12, 4  ;;  %s143_s14 = smov 128   ;;  %s18_s13 = int_to_ptr.vmem [resolvable:$true] %s17_s13 }
   0x3   :  { %s144_s15 = smov 8  }
   0x4   :  { %23 = dma.hbm_to_vmem [thread:$0]  %s16_s11, 256, %s18_s13, [#allocation3], %s143_s14, %s143_s14, %s144_s15  }
   0x5   :  { %138 = dma.done.wait [#allocation3], 256  }
   0x6   :  { %139 = vsyncadd [#allocation3], 4294967040  ;;  %v145_v0 = vmov 0   ;;  %v28_v1 = vld [vmem:[%s172_s0] sm:$0xff]  ;;  %v38_v2 = vld [vmem:[#allocation2 + $0x8] sm:$0xff]  ;;  %v29_v4 = vlaneseq  ;;  %vm39_vm0 = vcmask 130048  }
   0x7   :  { %89 = vset.pattern.permute.xlu0 %v145_v0  ;;  %57 = vmatpush.msra.mxu0 %v38_v2  ;;  %v37_v3 = vld [vmem:[#allocation2] sm:$0xff]  ;;  %v146_v7 = vmov 0.0   ;;  %s147_s1 = smov [#allocation5]   ;;  %s71_s21 = sshll.u32 %s174_s2, 4  ;;  %s72_s21 = int_to_ptr.hbm [resolvable:$true] %s71_s21 }
   0x8   :  { %32 = vperm.xlu0 %89, %v28_v1   ;;  %v30_v5 = vand.u32 127, %v29_v4  ;;  %s69_s18 = sshll.u32 %s147_s1, 4  ;;  %s70_s18 = int_to_ptr.vmem [resolvable:$true] %s69_s18 }
   0x9   :  { %58 = vmatpush.msra.mxu0 %v37_v3 }
  0x7a   :  { %v33_v6 = vpop.permute.xlu0 %32 }
  0x7b   :  { %vm34_vm1 = vcmp.eq.s32.totalorder %v33_v6, %v30_v5 }
  0x7c   :  { %v81_v8 = vsel %vm34_vm1, 1.0, %v146_v7 }
  0x7d   :  { %82 = vmatmul.msk.f32.vlgmr.msra.gmra.mxu0 %vm39_vm0, %v81_v8 }
  0xfa   :  { %v60_v9 = vpop.f32.mrf.mxu0 }
  0xfb   :  { %63 = vst [vmem:[#allocation5] sm:$0xff] %v60_v9 }
  0xfc   :  { %74 = dma.vmem_to_hbm [thread:$0]  %s70_s18, 128, %s72_s21, [#allocation4]  }
  0xfd   :  { %140 = dma.done.wait [#allocation4], 128  }
  0xfe   :  { %141 = vsyncadd [#allocation4], 4294967168 }
  0xff   :  { %79 = vsyncpa [#allocation3], 1 }
 0x100   :  { %80 = vsyncpa [#allocation4], 1 }

</bundles_post_ra>
